<compile_context>
chip_gen: v7x
topology: tpu7x:2x2x1
jax: 0.10.0
libtpu: 0.0.40
codegen_flags: <defaults>
</compile_context>

<pallas_src>
import functools

import jax
import jax.numpy as jnp
from jax.experimental import pallas as pl
from jax.experimental.pallas import tpu as pltpu

_LANES = 128
_ACC_SUBLANES = 8  # f32 accumulator vreg sublanes


def _sublane_multiple(dtype) -> int:
    """Native sublane packing: 8 for 4-byte, 16 for 2-byte, 32 for 1-byte."""
    itemsize = jnp.dtype(dtype).itemsize
    return 8 * max(1, 4 // max(1, itemsize))


def _tile_bytes_per_input() -> int:
    """Per-input streaming tile size (x2 inputs x2 pipeline buffers in VMEM)."""
    try:
        kind = jax.devices()[0].device_kind.lower()
    except Exception:
        return 2 << 20
    if ("v6" in kind) or ("v7" in kind):
        return 4 << 20   # 16 MiB total double-buffered, under 32 MiB default
    return 2 << 20       # 8 MiB total, under v5e's 16 MiB default scoped VMEM


def _masked_l1_block_kernel(x_ref, t_ref, cnt_ref, abs_ref, *,
                            block_rows, rows_per_core, total_rows, exact):
    """Accumulates count(t != 0) and sum(nan->0(|x - t|) over t != 0).

    Grid is (num_core_splits, blocks_per_core). cnt_ref / abs_ref are the
    (1, 8, 128) f32 output slices for this core split and stay VMEM-resident
    across the inner ("arbitrary") axis (standard accumulator pattern).
    """
    j = pl.program_id(1)

    @pl.when(j == 0)
    def _():
        cnt_ref[...] = jnp.zeros_like(cnt_ref)
        abs_ref[...] = jnp.zeros_like(abs_ref)

    # Hot path in the NATIVE dtype (packed bf16/f16 VPU on v6e/v7x).
    x = x_ref[...]
    t = t_ref[...]
    nonzero = t != 0                                  # torch.not_equal(target, 0)
    diff = jnp.abs(x - t)                             # torch.abs(input - target)
    diff = jnp.where(jnp.isnan(diff), 0, diff)        # NaN -> 0 (final torch.where)

    def accumulate(nz):
        masked = jnp.where(nz, diff, 0).astype(jnp.float32)
        cnt = nz.astype(jnp.float32)
        # Whole-vreg (8,128) partial sums: pure VPU adds, no sublane reduce.
        abs_ref[...] += masked.reshape(-1, _ACC_SUBLANES, _LANES).sum(axis=0)[None]
        cnt_ref[...] += cnt.reshape(-1, _ACC_SUBLANES, _LANES).sum(axis=0)[None]

    if exact:
        # Every block of every core split is full and in range: no masking.
        accumulate(nonzero)
    else:
        c = pl.program_id(0)
        row_end = jnp.minimum((c + 1) * rows_per_core, total_rows)
        block_start = c * rows_per_core + j * block_rows
        needs_mask = (block_start + block_rows) > row_end

        @pl.when(jnp.logical_not(needs_mask))
        def _():
            accumulate(nonzero)

        @pl.when(needs_mask)   # tail / duplicated block only (incl. single-block case)
        def _():
            rid = block_start + jax.lax.broadcasted_iota(
                jnp.int32, (block_rows, _LANES), 0)
            accumulate(jnp.logical_and(nonzero, rid < row_end))


@functools.partial(jax.jit, static_argnames=("reduction", "block_rows_cap"))
def masked_l1_loss(inp, tgt, reduction: str = "mean", block_rows_cap=None):
    assert inp.shape == tgt.shape, (inp.shape, tgt.shape)
    if reduction not in ("mean", "sum"):
        # TODO(synk): reduction='none' (elementwise loss output) not implemented.
        raise NotImplementedError("reduction='none' not implemented")

    n_elems = inp.size
    x_flat = inp.reshape(-1)   # contiguous reshape: free
    t_flat = tgt.reshape(-1)

    rem = n_elems % _LANES
    n_main = n_elems - rem

    s_mask = jnp.float32(0.0)
    s_abs = jnp.float32(0.0)

    if n_main > 0:
        rows = n_main // _LANES
        x_main = x_flat if rem == 0 else x_flat[:n_main]
        t_main = t_flat if rem == 0 else t_flat[:n_main]
        x2d = x_main.reshape(rows, _LANES)
        t2d = t_main.reshape(rows, _LANES)

        itemsize = jnp.dtype(inp.dtype).itemsize
        sub = _sublane_multiple(inp.dtype)
        if block_rows_cap is None:
            cap = (_tile_bytes_per_input() // (_LANES * itemsize)) // sub * sub
        else:
            cap = (int(block_rows_cap) // sub) * sub
        cap = max(sub, cap)
        block_rows = min(cap, ((rows + sub - 1) // sub) * sub)

        nblocks = pl.cdiv(rows, block_rows)
        # Leading "parallel" axis: splits blocks across the 2 TCs on v7x;
        # sequential (and at most one duplicated, fully-masked block) elsewhere.
        nsplit = 2 if nblocks >= 2 else 1
        bpc = pl.cdiv(nblocks, nsplit)
        rows_per_core = bpc * block_rows
        exact = (rows == nsplit * rows_per_core)

        if nsplit * bpc == nblocks:
            in_map = lambda c, j, bpc=bpc: (c * bpc + j, 0)
        else:
            # Core 1's last slot maps past the array; clamp (its rows are masked).
            in_map = lambda c, j, bpc=bpc, last=nblocks - 1: (
                jnp.minimum(c * bpc + j, last), 0)

        kernel = functools.partial(
            _masked_l1_block_kernel,
            block_rows=block_rows, rows_per_core=rows_per_core,
            total_rows=rows, exact=exact)

        in_spec = pl.BlockSpec((block_rows, _LANES), in_map)
        out_spec = pl.BlockSpec((1, _ACC_SUBLANES, _LANES), lambda c, j: (c, 0, 0))
        out_sd = jax.ShapeDtypeStruct((nsplit, _ACC_SUBLANES, _LANES), jnp.float32)

        cnt_out, abs_out = pl.pallas_call(
            kernel,
            out_shape=(out_sd, out_sd),
            grid_spec=pltpu.PrefetchScalarGridSpec(
                num_scalar_prefetch=0,
                grid=(nsplit, bpc),
                in_specs=[in_spec, in_spec],
                out_specs=[out_spec, out_spec],
            ),
            compiler_params=pltpu.CompilerParams(
                dimension_semantics=("parallel", "arbitrary")),
        )(x2d, t2d)

        s_mask = jnp.sum(cnt_out)
        s_abs = jnp.sum(abs_out)

    if rem:
        # <128-element lane-unaligned tail: tiny wrapper-side reduction
        # (avoids materializing padded/copied full arrays in HBM).
        x_tail = x_flat[n_main:]
        t_tail = t_flat[n_main:]
        nz_t = t_tail != 0
        d_t = jnp.abs(x_tail - t_tail)
        d_t = jnp.where(jnp.isnan(d_t), 0, d_t)
        m_t = jnp.where(nz_t, d_t, 0).astype(jnp.float32)
        s_abs = s_abs + jnp.sum(m_t)
        s_mask = s_mask + jnp.sum(nz_t.astype(jnp.float32))

    # mask /= mask.mean(); NaN (0/0) -> 0  ==>  no nonzero targets => loss == 0.
    if reduction == "mean":
        return jnp.where(s_mask > 0.0, s_abs / s_mask, jnp.float32(0.0))
    # sum(loss) = sum_abs * (N / sum_mask)
    return jnp.where(s_mask > 0.0,
                     s_abs * (jnp.float32(n_elems) / s_mask),
                     jnp.float32(0.0))


def _reference(inp, tgt, reduction="mean"):
    """Pure-JAX transcription of the PyTorch forward, for validation."""
    mask = (tgt != 0).astype(jnp.float32)
    mask = mask / jnp.mean(mask)
    mask = jnp.where(jnp.isnan(mask), 0.0, mask)
    loss = jnp.abs(inp - tgt).astype(jnp.float32)   # |x-t| in native dtype (as torch)
    loss = loss * mask
    loss = jnp.where(jnp.isnan(loss), 0.0, loss)
    if reduction == "mean":
        return jnp.mean(loss)
    elif reduction == "sum":
        return jnp.sum(loss)
    return loss


def _check(shape, key, zero_frac=0.5, dtype=jnp.float32, inject_nan=False,
           block_cap=None):
    k1, k2, k3 = jax.random.split(key, 3)
    inp = jax.random.normal(k1, shape, dtype=jnp.float32)
    tgt = jax.random.normal(k2, shape, dtype=jnp.float32)
    keep = jax.random.bernoulli(k3, 1.0 - zero_frac, shape)
    tgt = jnp.where(keep, tgt, 0.0)
    if inject_nan:
        inp = inp.reshape(-1).at[0].set(jnp.nan).reshape(shape)
    inp = inp.astype(dtype)
    tgt = tgt.astype(dtype)

    out_mean = jax.block_until_ready(
        masked_l1_loss(inp, tgt, reduction="mean", block_rows_cap=block_cap))
    out_sum = jax.block_until_ready(
        masked_l1_loss(inp, tgt, reduction="sum", block_rows_cap=block_cap))
    ref_mean = _reference(inp, tgt, "mean")
    ref_sum = _reference(inp, tgt, "sum")
    assert jnp.allclose(out_mean, ref_mean, rtol=1e-5, atol=1e-5), (
        shape, dtype, block_cap, out_mean, ref_mean)
    assert jnp.allclose(out_sum, ref_sum, rtol=1e-4, atol=1e-4), (
        shape, dtype, block_cap, out_sum, ref_sum)


if __name__ == "__main__":
    key = jax.random.PRNGKey(0)
    keys = jax.random.split(key, 9)

    # Primary NCHW-like case (exact-fit block, lane-aligned, single block).
    _check((2, 4, 16, 16), keys[0])

    # rows=30 < block_rows=32 -> exercises the tail-block row mask
    # (single block, so "program 0 is also the last program").
    _check((3, 5, 16, 16), keys[1])

    # 210 elems -> lane-unaligned prefix + wrapper tail path.
    _check((2, 3, 7, 5), keys[2])

    # 105 elems (< 128) -> tail-only path, Pallas kernel not invoked.
    _check((3, 5, 7), keys[3])

    # bf16 inputs -> native-dtype hot path, 16-row sublane rounding.
    _check((2, 4, 16, 16), keys[4], dtype=jnp.bfloat16)

    # NaN in the input -> scrubbed to zero, as in the PyTorch module.
    _check((2, 4, 16, 16), keys[5], inject_nan=True)

    # Multi-block, 2-way core split, even block count (no masking anywhere).
    _check((4, 8, 32, 32), keys[6], block_cap=64)

    # Multi-block, 2-way core split, odd block count (clamped duplicate block).
    _check((5, 8, 32, 32), keys[7], block_cap=64)

    # All-zero target -> mask.mean()==0 -> NaN mask -> 0 loss.
    inp = jax.random.normal(keys[8], (2, 4, 16, 16), dtype=jnp.float32)
    zero_tgt = jnp.zeros((2, 4, 16, 16), jnp.float32)
    out_zero = jax.block_until_ready(masked_l1_loss(inp, zero_tgt, reduction="mean"))
    assert jnp.allclose(out_zero, 0.0), out_zero

    print("KERNEL_OK")
</pallas_src>

<mosaic_0001>
module attributes {stable_mosaic.version = 11 : i64} {
  func.func @_masked_l1_block_kernel(%arg0: i32, %arg1: i32, %arg2: memref<16x128xf32, #tpu.memory_space<vmem>>, %arg3: memref<16x128xf32, #tpu.memory_space<vmem>>, %arg4: memref<1x8x128xf32, #tpu.memory_space<vmem>>, %arg5: memref<1x8x128xf32, #tpu.memory_space<vmem>>) attributes {dimension_semantics = [#tpu.dimension_semantics<parallel>, #tpu.dimension_semantics<arbitrary>], iteration_bounds = array<i64: 1, 1>, scalar_prefetch = 0 : i64, scratch_operands = 0 : i64, tpu.core_type = #tpu.core_type<tc>, window_params = [{transform_indices = @transform_0, window_bounds = array<i64: 16, 128>}, {transform_indices = @transform_1, window_bounds = array<i64: 16, 128>}, {transform_indices = @transform_2, window_bounds = array<i64: 1, 8, 128>}, {transform_indices = @transform_3, window_bounds = array<i64: 1, 8, 128>}]} {
    %c0_i32 = arith.constant 0 : i32
    %0 = arith.cmpi eq, %arg1, %c0_i32 : i32
    %1 = arith.extui %0 : i1 to i32
    %c0_i32_0 = arith.constant 0 : i32
    %2 = arith.cmpi ne, %1, %c0_i32_0 : i32
    scf.if %2 {
      %cst_20 = arith.constant 0.000000e+00 : f32
      %30 = vector.broadcast %cst_20 : f32 to vector<1x8x128xf32>
      %c0_21 = arith.constant 0 : index
      %c0_22 = arith.constant 0 : index
      %c0_23 = arith.constant 0 : index
      %31 = vector.load %arg4[%c0_21, %c0_22, %c0_23] : memref<1x8x128xf32, #tpu.memory_space<vmem>>, vector<1x8x128xf32>
      tpu.vector_store %arg4[%c0_21, %c0_22, %c0_23], %30 {strides = array<i32>} : memref<1x8x128xf32, #tpu.memory_space<vmem>>, vector<1x8x128xf32>,
      %cst_24 = arith.constant 0.000000e+00 : f32
      %32 = vector.broadcast %cst_24 : f32 to vector<1x8x128xf32>
      %c0_25 = arith.constant 0 : index
      %c0_26 = arith.constant 0 : index
      %c0_27 = arith.constant 0 : index
      %33 = vector.load %arg5[%c0_25, %c0_26, %c0_27] : memref<1x8x128xf32, #tpu.memory_space<vmem>>, vector<1x8x128xf32>
      tpu.vector_store %arg5[%c0_25, %c0_26, %c0_27], %32 {strides = array<i32>} : memref<1x8x128xf32, #tpu.memory_space<vmem>>, vector<1x8x128xf32>,
    } else {
    }
    %c0 = arith.constant 0 : index
    %c0_1 = arith.constant 0 : index
    %3 = vector.load %arg2[%c0, %c0_1] : memref<16x128xf32, #tpu.memory_space<vmem>>, vector<16x128xf32>
    %c0_2 = arith.constant 0 : index
    %c0_3 = arith.constant 0 : index
    %4 = vector.load %arg3[%c0_2, %c0_3] : memref<16x128xf32, #tpu.memory_space<vmem>>, vector<16x128xf32>
    %cst = arith.constant 0.000000e+00 : f32
    %5 = vector.broadcast %cst : f32 to vector<16x128xf32>
    %6 = arith.cmpf one, %4, %5 : vector<16x128xf32>
    %7 = arith.subf %3, %4 : vector<16x128xf32>
    %8 = math.absf %7 : vector<16x128xf32>
    %9 = arith.cmpf one, %8, %8 : vector<16x128xf32>
    %c0_i32_4 = arith.constant 0 : i32
    %10 = arith.sitofp %c0_i32_4 : i32 to f32
    %11 = vector.broadcast %10 : f32 to vector<16x128xf32>
    %12 = arith.select %9, %11, %8 : vector<16x128xi1>, vector<16x128xf32>
    %c0_i32_5 = arith.constant 0 : i32
    %13 = arith.sitofp %c0_i32_5 : i32 to f32
    %14 = vector.broadcast %13 : f32 to vector<16x128xf32>
    %15 = arith.select %6, %12, %14 : vector<16x128xi1>, vector<16x128xf32>
    %16 = arith.extui %6 : vector<16x128xi1> to vector<16x128xi32>
    %17 = arith.sitofp %16 : vector<16x128xi32> to vector<16x128xf32>
    %c0_6 = arith.constant 0 : index
    %c0_7 = arith.constant 0 : index
    %c0_8 = arith.constant 0 : index
    %18 = vector.load %arg5[%c0_6, %c0_7, %c0_8] : memref<1x8x128xf32, #tpu.memory_space<vmem>>, vector<1x8x128xf32>
    %19 = vector.shape_cast %15 : vector<16x128xf32> to vector<2x8x128xf32>
    %cst_9 = arith.constant dense<0.000000e+00> : vector<8x128xf32>
    %20 = vector.multi_reduction <add>, %19, %cst_9 [0] : vector<2x8x128xf32> to vector<8x128xf32>
    %21 = vector.shape_cast %20 : vector<8x128xf32> to vector<1x8x128xf32>
    %22 = arith.addf %18, %21 : vector<1x8x128xf32>
    %c0_10 = arith.constant 0 : index
    %c0_11 = arith.constant 0 : index
    %c0_12 = arith.constant 0 : index
    %23 = vector.load %arg5[%c0_10, %c0_11, %c0_12] : memref<1x8x128xf32, #tpu.memory_space<vmem>>, vector<1x8x128xf32>
    tpu.vector_store %arg5[%c0_10, %c0_11, %c0_12], %22 {strides = array<i32>} : memref<1x8x128xf32, #tpu.memory_space<vmem>>, vector<1x8x128xf32>,
    %c0_13 = arith.constant 0 : index
    %c0_14 = arith.constant 0 : index
    %c0_15 = arith.constant 0 : index
    %24 = vector.load %arg4[%c0_13, %c0_14, %c0_15] : memref<1x8x128xf32, #tpu.memory_space<vmem>>, vector<1x8x128xf32>
    %25 = vector.shape_cast %17 : vector<16x128xf32> to vector<2x8x128xf32>
    %cst_16 = arith.constant dense<0.000000e+00> : vector<8x128xf32>
    %26 = vector.multi_reduction <add>, %25, %cst_16 [0] : vector<2x8x128xf32> to vector<8x128xf32>
    %27 = vector.shape_cast %26 : vector<8x128xf32> to vector<1x8x128xf32>
    %28 = arith.addf %24, %27 : vector<1x8x128xf32>
    %c0_17 = arith.constant 0 : index
    %c0_18 = arith.constant 0 : index
    %c0_19 = arith.constant 0 : index
    %29 = vector.load %arg4[%c0_17, %c0_18, %c0_19] : memref<1x8x128xf32, #tpu.memory_space<vmem>>, vector<1x8x128xf32>
    tpu.vector_store %arg4[%c0_17, %c0_18, %c0_19], %28 {strides = array<i32>} : memref<1x8x128xf32, #tpu.memory_space<vmem>>, vector<1x8x128xf32>,
    return
  }
  func.func @transform_0(%arg0: i32, %arg1: i32) -> (i32, i32) {
    %c1_i32 = arith.constant 1 : i32
    %0 = arith.muli %arg0, %c1_i32 : i32
    %1 = arith.addi %0, %arg1 : i32
    %c0_i32 = arith.constant 0 : i32
    %c0_i32_0 = arith.constant 0 : i32
    return %1, %c0_i32 : i32, i32
  }
  func.func @transform_1(%arg0: i32, %arg1: i32) -> (i32, i32) {
    %c1_i32 = arith.constant 1 : i32
    %0 = arith.muli %arg0, %c1_i32 : i32
    %1 = arith.addi %0, %arg1 : i32
    %c0_i32 = arith.constant 0 : i32
    %c0_i32_0 = arith.constant 0 : i32
    return %1, %c0_i32 : i32, i32
  }
  func.func @transform_2(%arg0: i32, %arg1: i32) -> (i32, i32, i32) {
    %c0_i32 = arith.constant 0 : i32
    %c0_i32_0 = arith.constant 0 : i32
    %c0_i32_1 = arith.constant 0 : i32
    return %arg0, %c0_i32, %c0_i32_0 : i32, i32, i32
  }
  func.func @transform_3(%arg0: i32, %arg1: i32) -> (i32, i32, i32) {
    %c0_i32 = arith.constant 0 : i32
    %c0_i32_0 = arith.constant 0 : i32
    %c0_i32_1 = arith.constant 0 : i32
    return %arg0, %c0_i32, %c0_i32_0 : i32, i32, i32
  }
}

</mosaic_0001>

<bundles_post_ra>
// kernel: masked_l1_loss.1
= control target key start
LH: loop header
LB: loop body
LE: loop exit
PB: predicated region body
PF: predicated region fallthrough
CT: control target
= control target key end

     0   :  { %v114_v6 = vmov 0.0   ;;  %s153_s0 = inlined_call_operand.vmem [shape: f32[16,128], index: 0, kind: input, shape index: {}]   ;;  %s154_s1 = inlined_call_operand.vmem [shape: f32[16,128], index: 1, kind: input, shape index: {}]   ;;  %s155_s2 = inlined_call_operand.vmem [shape: f32[1,8,128], index: 2, kind: output, shape index: {0}]   ;;  %s156_s3 = inlined_call_operand.vmem [shape: f32[1,8,128], index: 3, kind: output, shape index: {1}]  }
   0x1   :  { %v63_v0 = vld [vmem:[%s153_s0] sm:$0xff]  ;;  %v64_v1 = vld [vmem:[%s153_s0 + $0x8] sm:$0xff] }
   0x2   :  { %v65_v2 = vld [vmem:[%s154_s1] sm:$0xff]  ;;  %v66_v3 = vld [vmem:[%s154_s1 + $0x8] sm:$0xff] }
   0x3   :  { %vm67_vm0 = vcmp.ne.f32.partialorder %v65_v2, 0.0  ;;  %v69_v4 = vsub.f32 %v63_v0, %v65_v2  ;;  %vm68_vm1 = vcmp.ne.f32.partialorder %v66_v3, 0.0  ;;  %v70_v5 = vsub.f32 %v64_v1, %v66_v3 }
   0x4   :  { %v111_v7 = vsel %vm67_vm0, 1.0, %v114_v6  ;;  %v112_v9 = vsel %vm68_vm1, 1.0, %v114_v6 }
   0x5   :  { %v71_v8 = vand.u32 2147483647, %v69_v4  ;;  %v72_v10 = vand.u32 2147483647, %v70_v5  ;;  %v88_v11 = vadd.f32 %v112_v9, %v111_v7 }
   0x7   :  { %vm73_vm2 = vcmp.ne.f32.partialorder %v71_v8, %v71_v8  ;;  %vm74_vm3 = vcmp.ne.f32.partialorder %v72_v10, %v72_v10  ;;  %90 = vst [vmem:[%s155_s2] sm:$0xff] %v88_v11 }
   0x8   :  { %v75_v12 = vsel %vm73_vm2, 0.0, %v71_v8  ;;  %v76_v13 = vsel %vm74_vm3, 0.0, %v72_v10 }
   0x9   :  { %v77_v14 = vsel %vm67_vm0, %v75_v12, 0.0  ;;  %v78_v15 = vsel %vm68_vm1, %v76_v13, 0.0 }
   0xa   :  { %v84_v16 = vadd.f32 %v78_v15, %v77_v14 }
   0xc   :  { %86 = vst [vmem:[%s156_s3] sm:$0xff] %v84_v16 }

</bundles_post_ra>
